<compile_context>
chip_gen: v5e
topology: v5e:2x2
jax: 0.10.0
libtpu: 0.0.40
codegen_flags: <defaults>
</compile_context>

<pallas_src>
import functools

import jax
import jax.numpy as jnp
from jax.experimental import pallas as pl
from jax.experimental.pallas import tpu as pltpu


def _kl_div_kernel(p_ref, q_ref, o_ref, *, tile_rows, total_rows, mask_rows):
    p = p_ref[...].astype(jnp.float32)
    q = q_ref[...].astype(jnp.float32)

    # Numerically-stable shifted logits.
    p_shift = p - jnp.max(p, axis=-1, keepdims=True)
    q_shift = q - jnp.max(q, axis=-1, keepdims=True)
    p_exp = jnp.exp(p_shift)
    q_exp = jnp.exp(q_shift)
    p_sum = jnp.sum(p_exp, axis=-1, keepdims=True)   # (TR, 1)
    q_sum = jnp.sum(q_exp, axis=-1, keepdims=True)   # (TR, 1)

    # xlogy-style guard: where p_exp == 0 (p_shift == -inf) the PyTorch result
    # is exactly 0; the naive product would be 0 * (-inf) = NaN.
    term = jnp.where(p_exp == 0.0, 0.0, p_exp * (p_shift - q_shift))
    inner = jnp.sum(term, axis=-1, keepdims=True)     # (TR, 1)

    # Factored per-row KL; the divide goes to the EUP slot, one log instead of two.
    inv_p_sum = pl.reciprocal(p_sum, approx=True)     # (TR, 1)
    row_kl = inner * inv_p_sum + jnp.log(q_sum * inv_p_sum)

    if mask_rows:
        # Ragged last tile: zero the contribution of padded (garbage) rows.
        row0 = pl.program_id(0) * tile_rows
        row_ids = row0 + jax.lax.broadcasted_iota(jnp.int32, (tile_rows, 1), 0)
        row_kl = jnp.where(row_ids < total_rows, row_kl, 0.0)

    # One partial sum per grid step; wrapper reads [i, 0, 0].
    o_ref[...] = jnp.full(o_ref.shape, jnp.sum(row_kl), jnp.float32)


def _round_up(x, m):
    return ((x + m - 1) // m) * m


def _choose_tiling(rows, d, in_itemsize):
    """Returns (tile_rows, vmem_limit_bytes) — byte-based, generation-aware."""
    try:
        vmem_cap = pltpu.get_tpu_info().vmem_capacity_bytes
    except Exception:
        vmem_cap = 64 * 1024 * 1024  # conservative (v7x-sized) fallback
    if vmem_cap >= 128 * 1024 * 1024:
        # v5e / v6e: 128 MiB VMEM per TensorCore — big tiles, raised scoped limit.
        data_budget = 84 * 1024 * 1024
        vmem_limit = 108 * 1024 * 1024
    else:
        # v7x (64 MiB physical): keep headroom below the cap for compiler scratch.
        data_budget = 40 * 1024 * 1024
        vmem_limit = 52 * 1024 * 1024

    # Per-row VMEM: 2 inputs x 2 pipeline buffers + ~6 f32 working arrays.
    bytes_per_row = d * (4 * in_itemsize + 6 * 4)
    tr = max(8, (data_budget // max(bytes_per_row, 1)) // 8 * 8)
    tr = min(tr, _round_up(rows, 8))
    if rows > 8:
        # Guarantee >= 2 grid steps so v7x's two TensorCores both get work.
        tr = min(tr, _round_up(-(-rows // 2), 8))
    return max(tr, 8), vmem_limit


def kl_div_loss(p, q):
    """Pallas implementation of KLDivLoss.forward(p, q). Returns an f32 scalar."""
    assert p.shape == q.shape
    d = p.shape[-1]
    rows = 1
    for s in p.shape[:-1]:
        rows *= s
    p2 = p.reshape(rows, d)
    q2 = q.reshape(rows, d)

    tr, vmem_limit = _choose_tiling(rows, d, p2.dtype.itemsize)
    num_tiles = pl.cdiv(rows, tr)

    partials = pl.pallas_call(
        functools.partial(
            _kl_div_kernel,
            tile_rows=tr,
            total_rows=rows,
            mask_rows=(rows % tr != 0),
        ),
        out_shape=jax.ShapeDtypeStruct((num_tiles, 8, 128), jnp.float32),
        grid=(num_tiles,),
        in_specs=[
            pl.BlockSpec((tr, d), lambda i: (i, 0)),
            pl.BlockSpec((tr, d), lambda i: (i, 0)),
        ],
        out_specs=pl.BlockSpec((1, 8, 128), lambda i: (i, 0, 0)),
        compiler_params=pltpu.CompilerParams(
            dimension_semantics=("parallel",),
            vmem_limit_bytes=vmem_limit,
        ),
    )(p2, q2)

    # Denominator reciprocal in Python double precision (exact for N > 2^24 too).
    inv_n = 1.0 / float(rows * d)
    return jnp.sum(partials[:, 0, 0]) * jnp.float32(inv_n)


def _reference(p, q):
    # Pure-JAX reference matching F.kl_div(q.log_softmax, p.softmax, reduction='mean').
    p_soft = jax.nn.softmax(p, axis=-1)
    log_p = jax.nn.log_softmax(p, axis=-1)
    log_q = jax.nn.log_softmax(q, axis=-1)
    return jnp.mean(p_soft * (log_p - log_q))


if __name__ == "__main__":
    key = jax.random.PRNGKey(0)
    kp, kq = jax.random.split(key)
    # Small shapes consistent with the module: (batch=2, seq=8, hidden=32).
    p = jax.random.normal(kp, (2, 8, 32), dtype=jnp.float32)
    q = jax.random.normal(kq, (2, 8, 32), dtype=jnp.float32)

    loss = kl_div_loss(p, q)
    jax.block_until_ready(loss)
    ref = _reference(p, q)
    assert jnp.allclose(loss, ref, atol=1e-4, rtol=1e-4), (loss, ref)

    # Ragged-row case (rows % tile_rows != 0) exercises the last-tile mask.
    kp2, kq2 = jax.random.split(jax.random.PRNGKey(1))
    p_r = jax.random.normal(kp2, (3, 5, 32), dtype=jnp.float32)
    q_r = jax.random.normal(kq2, (3, 5, 32), dtype=jnp.float32)
    loss_r = kl_div_loss(p_r, q_r)
    jax.block_until_ready(loss_r)
    ref_r = _reference(p_r, q_r)
    assert jnp.allclose(loss_r, ref_r, atol=1e-4, rtol=1e-4), (loss_r, ref_r)

    print("KERNEL_OK")
</pallas_src>

<mosaic_0001>
module attributes {stable_mosaic.version = 11 : i64} {
  func.func @_kl_div_kernel(%arg0: i32, %arg1: memref<8x32xf32, #tpu.memory_space<vmem>>, %arg2: memref<8x32xf32, #tpu.memory_space<vmem>>, %arg3: memref<1x8x128xf32, #tpu.memory_space<vmem>>) attributes {dimension_semantics = [#tpu.dimension_semantics<parallel>], iteration_bounds = array<i64: 2>, scalar_prefetch = 0 : i64, scratch_operands = 0 : i64, tpu.core_type = #tpu.core_type<tc>, window_params = [{transform_indices = @transform_0, window_bounds = array<i64: 8, 32>}, {transform_indices = @transform_1, window_bounds = array<i64: 8, 32>}, {transform_indices = @transform_2, window_bounds = array<i64: 1, 8, 128>}]} {
    %c0 = arith.constant 0 : index
    %c0_0 = arith.constant 0 : index
    %0 = vector.load %arg1[%c0, %c0_0] : memref<8x32xf32, #tpu.memory_space<vmem>>, vector<8x32xf32>
    %c0_1 = arith.constant 0 : index
    %c0_2 = arith.constant 0 : index
    %1 = vector.load %arg2[%c0_1, %c0_2] : memref<8x32xf32, #tpu.memory_space<vmem>>, vector<8x32xf32>
    %cst = arith.constant dense<0xFF800000> : vector<8xf32>
    %2 = vector.multi_reduction <maximumf>, %0, %cst [1] : vector<8x32xf32> to vector<8xf32>
    %3 = vector.shape_cast %2 : vector<8xf32> to vector<8x1xf32>
    %4 = vector.broadcast %3 : vector<8x1xf32> to vector<8x32xf32>
    %5 = arith.subf %0, %4 : vector<8x32xf32>
    %cst_3 = arith.constant dense<0xFF800000> : vector<8xf32>
    %6 = vector.multi_reduction <maximumf>, %1, %cst_3 [1] : vector<8x32xf32> to vector<8xf32>
    %7 = vector.shape_cast %6 : vector<8xf32> to vector<8x1xf32>
    %8 = vector.broadcast %7 : vector<8x1xf32> to vector<8x32xf32>
    %9 = arith.subf %1, %8 : vector<8x32xf32>
    %10 = math.exp %5 : vector<8x32xf32>
    %11 = math.exp %9 : vector<8x32xf32>
    %cst_4 = arith.constant dense<0.000000e+00> : vector<8xf32>
    %12 = vector.multi_reduction <add>, %10, %cst_4 [1] : vector<8x32xf32> to vector<8xf32>
    %13 = vector.shape_cast %12 : vector<8xf32> to vector<8x1xf32>
    %cst_5 = arith.constant dense<0.000000e+00> : vector<8xf32>
    %14 = vector.multi_reduction <add>, %11, %cst_5 [1] : vector<8x32xf32> to vector<8xf32>
    %15 = vector.shape_cast %14 : vector<8xf32> to vector<8x1xf32>
    %cst_6 = arith.constant 0.000000e+00 : f32
    %16 = vector.broadcast %cst_6 : f32 to vector<8x32xf32>
    %17 = arith.cmpf oeq, %10, %16 : vector<8x32xf32>
    %18 = arith.subf %5, %9 : vector<8x32xf32>
    %19 = arith.mulf %10, %18 : vector<8x32xf32>
    %cst_7 = arith.constant 0.000000e+00 : f32
    %20 = vector.broadcast %cst_7 : f32 to vector<8x32xf32>
    %21 = arith.select %17, %20, %19 : vector<8x32xi1>, vector<8x32xf32>
    %cst_8 = arith.constant dense<0.000000e+00> : vector<8xf32>
    %22 = vector.multi_reduction <add>, %21, %cst_8 [1] : vector<8x32xf32> to vector<8xf32>
    %23 = vector.shape_cast %22 : vector<8xf32> to vector<8x1xf32>
    %24 = tpu.reciprocal %13 {approx = true} : vector<8x1xf32> -> vector<8x1xf32>
    %25 = arith.mulf %23, %24 : vector<8x1xf32>
    %26 = arith.mulf %15, %24 : vector<8x1xf32>
    %27 = math.log %26 : vector<8x1xf32>
    %28 = arith.addf %25, %27 : vector<8x1xf32>
    %29 = vector.shape_cast %28 : vector<8x1xf32> to vector<1x8x1xf32>
    %cst_9 = arith.constant dense<0.000000e+00> : vector<1xf32>
    %30 = vector.multi_reduction <add>, %29, %cst_9 [1, 2] : vector<1x8x1xf32> to vector<1xf32>
    %31 = vector.shape_cast %30 : vector<1xf32> to vector<1x1x1xf32>
    %32 = vector.extract %31[0, 0, 0] : f32 from vector<1x1x1xf32>
    %33 = vector.broadcast %32 : f32 to vector<1x8x128xf32>
    %c0_10 = arith.constant 0 : index
    %c0_11 = arith.constant 0 : index
    %c0_12 = arith.constant 0 : index
    %34 = vector.load %arg3[%c0_10, %c0_11, %c0_12] : memref<1x8x128xf32, #tpu.memory_space<vmem>>, vector<1x8x128xf32>
    tpu.vector_store %arg3[%c0_10, %c0_11, %c0_12], %33 {strides = array<i32>} : memref<1x8x128xf32, #tpu.memory_space<vmem>>, vector<1x8x128xf32>,
    return
  }
  func.func @transform_0(%arg0: i32) -> (i32, i32) {
    %c0_i32 = arith.constant 0 : i32
    %c0_i32_0 = arith.constant 0 : i32
    return %arg0, %c0_i32 : i32, i32
  }
  func.func @transform_1(%arg0: i32) -> (i32, i32) {
    %c0_i32 = arith.constant 0 : i32
    %c0_i32_0 = arith.constant 0 : i32
    return %arg0, %c0_i32 : i32, i32
  }
  func.func @transform_2(%arg0: i32) -> (i32, i32, i32) {
    %c0_i32 = arith.constant 0 : i32
    %c0_i32_0 = arith.constant 0 : i32
    %c0_i32_1 = arith.constant 0 : i32
    return %arg0, %c0_i32, %c0_i32_0 : i32, i32, i32
  }
}

</mosaic_0001>

<bundles_post_ra>
// kernel: tpu_custom_call.1
= control target key start
LH: loop header
LB: loop body
LE: loop exit
PB: predicated region body
PF: predicated region fallthrough
CT: control target
= control target key end

     0   :  { %7 = vsyncpa [#allocation3], 0  ;;  %s749_s0 = inlined_call_operand.hbm [shape: f32[16,32], index: 0, kind: input, shape index: {}]   ;;  %s750_s1 = inlined_call_operand.hbm [shape: f32[16,32], index: 1, kind: input, shape index: {}]   ;;  %s751_s2 = inlined_call_operand.hbm [shape: f32[2,8,128], index: 2, kind: output, shape index: {}]  }
   0x1   :  { %9 = vsyncpa [#allocation3 + $0x1], 0 }
   0x2   :  { %10 = vsyncpa [#allocation6], 0 }
   0x3   :  { %12 = vsyncpa [#allocation6 + $0x1], 0 }
   0x4   :  { %13 = vsyncpa [#allocation4], 0 }
   0x5   :  { %15 = vsyncpa [#allocation4 + $0x1], 0  ;;  %s579_s9 = smov 0   ;;  %s581_s10 = smov 0  }
   0x6   :  { %s583_s11 = smov 0   ;;  %s585_s12 = smov 0  }
   0x7 LB: > { %s600_s13 = sadd.s32 4294967295, %s562_s12   ;;  %s356_s14 = sadd.s32 4294967294, %s562_s12   ;;  %s562_s12 = sphi %s585_s12, %s762_s12   ;;  %s558_s11 = sphi %s583_s11, %s761_s11   ;;  %s554_s10 = sphi %s581_s10, %s760_s10   ;;  %s550_s9 = sphi %s579_s9, %s759_s9  }
   0x8   : > { %s604_s15 = sadd.s32 1, %s562_s12   ;;  %s28_s16 = sadd.s32 1, %s558_s11 }
   0x9   : > { %s25_s17 = ssub.s32 %s562_s12, %s604_s15  ;;  %p35_p0 = scmp.ne.s32.totalorder %s558_s11, %s554_s10 }
   0xa   : > { %p26_p1 = scmp.eq.s32.totalorder %s25_s17, 0  ;;  %p36_p2 = scmp.eq.s32.totalorder %s562_s12, 0 }
   0xb   : > { %p41_p3 = scmp.ne.s32.totalorder %s554_s10, %s550_s9  ;;  %p42_p4 = scmp.eq.s32.totalorder %s600_s13, 0 }
   0xc   : > { %s616_s18 = scalar_select %p26_p1, %s558_s11, %s28_s16  }
   0xd   : > { %p618_p5 = por %p36_p2, %p35_p0  ;;  %p622_p6 = por %p42_p4, %p41_p3 }
   0xe   : > { %p91_p7 = scmp.eq.s32.totalorder %s600_s13, 1  ;;  %p97_p8 = scmp.eq.s32.totalorder %s356_s14, 1 }
   0xf   : > { %p390_p10 = scmp.lt.s32.totalorder %s562_s12, 2  ;;  %s638_s23 = sand.u32 1, %s558_s11  }
  0x10   : > { %p629_p11 = por %p91_p7, %p35_p0  ;;  %p633_p12 = por %p97_p8, %p41_p3 }
  0x11   : > { %s360_s24 = sshll.u32 %s562_s12, 3  ;;  %s359_s25 = sshll.u32 %s638_s23, 3 }
  0x12   : > { %s125_s28 = scalar_lea.hbm %s749_s0, %s360_s24  ;;  %s121_s30 = scalar_lea.vmem [#allocation2], %s359_s25 }
  0x13   : > { %s127_s29 = sshll.u32 %s125_s28, 4  ;;  %s129_s3 = sshll.u32 %s121_s30, 4  ;;  %s128_s29 = int_to_ptr.hbm [resolvable:$true] %s127_s29  ;;  %s130_s3 = int_to_ptr.vmem [resolvable:$true] %s129_s3 }
  0x14   : > { %p647_p13 = pnand %p390_p10, %p618_p5  ;;  %p363_p0 = scmp.ge.s32.totalorder %s562_s12, 1 }
  0x15   : > { %p153_p1 = scmp.lt.s32.totalorder %s562_s12, 3  ;;  %s118_s5 = scalar_lea.sflag [#allocation3], %s638_s23 }
  0x16   : > { %s432_s6 = sshra.s32 %s128_s29, 4  ;;  %p436_p3 = pneg %p647_p13  ;;  %s433_s6 = int_to_ptr.hbm [resolvable:$true] %s432_s6 }
  0x17   : > { %s434_s7 = scalar_lea.hbm %s433_s6, 8  ;;  %s439_s16 = scalar_lea.hbm %s749_s0, 16 }
  0x18   : > { %p435_p2 = scmp.ne.s32.totalorder %s433_s6, %s434_s7  ;;  %p440_p5 = scmp.lt.s32.totalorder %s433_s6, %s749_s0 }
  0x19   : > { %p441_p8 = scmp.lt.s32.totalorder %s439_s16, %s434_s7 }
  0x1a   : > { %p437_p4 = pnand %p436_p3, %p435_p2 }
  0x1b   : > { %p442_p10 = por %p441_p8, %p440_p5 }
  0x1c   : > { %p438_p7 = pneg %p437_p4 }
  0x1e   : > { %p443_p9 = pnand %p442_p10, %p438_p7 }
  0x20   : > { %446 = shalt.err (!%p443_p9)
}
  0x21   : > { %382 = dma.hbm_to_vmem [thread:$0]  (!%p647_p13), %s128_s29, 128, %s130_s3, %s118_s5  }
  0x22   : > { %p671_p2 = pnand %p363_p0, %p153_p1  ;;  %s144_s30 = scalar_lea.hbm %s750_s1, %s360_s24 }
  0x23   : > { %s146_s6 = sshll.u32 %s144_s30, 4  ;;  %s140_s7 = scalar_lea.vmem [#allocation5], %s359_s25  ;;  %s147_s6 = int_to_ptr.hbm [resolvable:$true] %s146_s6 }
  0x24   : > { %s148_s8 = sshll.u32 %s140_s7, 4  ;;  %s137_s14 = scalar_lea.sflag [#allocation6], %s638_s23  ;;  %s149_s8 = int_to_ptr.vmem [resolvable:$true] %s148_s8 }
  0x25   : > { %s462_s16 = sshra.s32 %s147_s6, 4  ;;  %s469_s5 = scalar_lea.hbm %s750_s1, 16  ;;  %s463_s16 = int_to_ptr.hbm [resolvable:$true] %s462_s16 }
  0x26   : > { %s464_s17 = scalar_lea.hbm %s463_s16, 8  ;;  %p470_p4 = scmp.lt.s32.totalorder %s463_s16, %s750_s1 }
  0x27   : > { %p465_p9 = scmp.ne.s32.totalorder %s463_s16, %s464_s17  ;;  %p471_p7 = scmp.lt.s32.totalorder %s469_s5, %s464_s17 }
  0x29   : > { %p467_p0 = pnand %p465_p9, %p436_p3  ;;  %p472_p5 = por %p471_p7, %p470_p4 }
  0x2b   : > { %p468_p1 = pneg %p467_p0 }
  0x2d   : > { %p473_p8 = pnand %p472_p5, %p468_p1 }
  0x2f   : > { %476 = shalt.err (!%p473_p8)
}
  0x30   : > { %385 = dma.hbm_to_vmem [thread:$0]  (!%p647_p13), %s147_s6, 128, %s149_s8, %s137_s14  }
  0x31   : > { %157 = sbr.rel (%p671_p2) target bundleno = 507 (0x1fb), region = 28  ;;  %s693_s23 = sand.u32 (!%p671_p2), 1, %s554_s10  }
  0x32   : > { %s696_s25 = sshll.u32 (!%p671_p2), %s693_s23, 3  ;;  %s160_s27 = scalar_lea.sflag (!%p671_p2), [#allocation3], %s693_s23 }
  0x33   : > { %s163_s28 = scalar_lea.vmem (!%p671_p2), [#allocation2], %s696_s25 }
  0x36   : > { %537 = dma.done.wait (%p622_p6), %s160_s27, 128  }
  0x37   : > { %539 = vsyncadd (%p622_p6), %s160_s27, 4294967168  ;;  %s170_s4 = scalar_lea.sflag [#allocation6], %s693_s23  ;;  %s173_s26 = scalar_lea.vmem [#allocation5], %s696_s25 }
  0x38   : > { %541 = dma.done.wait (%p622_p6), %s170_s4, 128  }
  0x39   : > { %543 = vsyncadd (%p622_p6), %s170_s4, 4294967168  ;;  %vm202_vm0 = vcmask 261120   ;;  %v200_v0 = vld [vmem:[%s163_s28] sm:$0xff]  ;;  %v201_v2 = vld [vmem:[%s173_s26] sm:$0xff]  ;;  %vm234_vm2 = vcmask 7168   ;;  %s368_s20 = sshll.u32 %s600_s13, 3 }
  0x3a   : > { %v203_v1 = vsel %vm202_vm0, %v200_v0, -inf  ;;  %v207_v3 = vsel %vm202_vm0, %v201_v2, -inf  ;;  %s258_s7 = scalar_lea.hbm %s751_s2, %s368_s20  ;;  %s199_s8 = scalar_lea.vmem [#allocation7], %s696_s25 }
  0x3b   : > { %204 = vmax.xlane.f32.xlu0 %v203_v1  ;;  %s260_s14 = sshll.u32 %s199_s8, 4  ;;  %s262_s16 = sshll.u32 %s258_s7, 4  ;;  %s261_s14 = int_to_ptr.vmem [resolvable:$true] %s260_s14  ;;  %s263_s16 = int_to_ptr.hbm [resolvable:$true] %s262_s16 }
  0x3c   : > { %s248_s29 = scalar_lea.sflag [#allocation4], %s693_s23  ;;  %s506_s3 = sshra.s32 %s263_s16, 4  ;;  %s507_s3 = int_to_ptr.hbm [resolvable:$true] %s506_s3 }
  0x3d   : > { %s508_s5 = scalar_lea.hbm %s507_s3, 8  ;;  %s512_s24 = scalar_lea.hbm %s751_s2, 16 }
  0x3e   : > { %p509_p6 = scmp.ne.s32.totalorder %s507_s3, %s508_s5  ;;  %p513_p10 = scmp.lt.s32.totalorder %s507_s3, %s751_s2 }
  0x3f   : > { %p514_p2 = scmp.lt.s32.totalorder %s512_s24, %s508_s5 }
  0x40   : > { %p510_p13 = pnand %p509_p6, %p629_p11 }
  0x41   : > { %p515_p9 = por %p514_p2, %p513_p10 }
  0x42   : > { %p511_p3 = pneg %p510_p13 }
  0x43   : > { %208 = vmax.xlane.f32.xlu0 %v207_v3 }
  0x44   : > { %p516_p0 = pnand %p515_p9, %p511_p3 }
  0xae   : > { %v205_v4 = vpop.xlane.xlu0 %204 }
  0xaf   : > { %v206_v5 = vsub.f32 %v200_v0, %v205_v4 }
  0xb1   : > { %v211_v6 = vmul.f32 1.442695, %v206_v5 }
  0xb3   : > { %424 = vpow2.f32 %v211_v6 }
  0xb6   : > { %v209_v7 = vpop.xlane.xlu0 %208 }
  0xb7   : > { %v210_v8 = vsub.f32 %v201_v2, %v209_v7 }
  0xb9   : > { %v425_v9 = vpop.eup %424  ;;  %v213_v10 = vmul.f32 1.442695, %v210_v8  ;;  %v222_v11 = vsub.f32 %v206_v5, %v210_v8 }
  0xba   : > { %v215_v12 = vsel %vm202_vm0, %v425_v9, 0.0  ;;  %vm221_vm1 = vcmp.eq.f32.partialorder %v425_v9, 0.0 }
  0xbb   : > { %426 = vpow2.f32 %v213_v10  ;;  %216 = vadd.xlane.f32.xlu1 %v215_v12  ;;  %v223_v13 = vmul.f32 %v425_v9, %v222_v11 }
  0xbd   : > { %v224_v14 = vsel %vm221_vm1, 0.0, %v223_v13 }
  0xbe   : > { %v225_v15 = vsel %vm202_vm0, %v224_v14, 0.0 }
  0xbf   : > { %226 = vadd.xlane.f32.xlu2 %v225_v15 }
  0xc1   : > { %v427_v16 = vpop.eup %426 }
  0xc2   : > { %v218_v17 = vsel %vm202_vm0, %v427_v16, 0.0 }
  0xc3   : > { %219 = vadd.xlane.f32.xlu1 %v218_v17 }
 0x12e   : > { %v217_v18 = vpop.xlane.xlu1 %216 }
 0x12f   : > { %428 = vrcp.f32 %v217_v18 }
 0x132   : > { %v227_v23 = vpop.xlane.xlu2 %226 }
 0x135   : > { %v429_v19 = vpop.eup %428 }
 0x136   : > { %v220_v20 = vpop.xlane.xlu1 %219  ;;  %v229_v24 = vmul.f32 %v429_v19, %v227_v23 }
 0x137   : > { %v230_v21 = vmul.f32 %v429_v19, %v220_v20 }
 0x139   : > { %430 = vlog2.f32 %v230_v21 }
 0x13f   : > { %v431_v22 = vpop.eup %430 }
 0x140   : > { %v232_v25 = vmul.f32 0.6931472, %v431_v22 }
 0x142   : > { %v233_v26 = vadd.f32 %v232_v25, %v229_v24 }
 0x144   : > { %v235_v27 = vsel %vm234_vm2, %v233_v26, 0.0 }
 0x145   : > { %236 = vadd.xlane.f32.xlu2 %v235_v27 }
 0x1b8   : > { %v237_v28 = vpop.xlane.xlu2 %236 }
 0x1b9   : > { %v238_v29 = vrot.slane %v237_v28, 4 }
 0x1bb   : > { %v239_v30 = vadd.f32 %v238_v29, %v237_v28 }
 0x1bd   : > { %v240_v31 = vrot.slane %v239_v30, 2 }
 0x1bf   : > { %v241_v32 = vadd.f32 %v240_v31, %v239_v30 }
 0x1c1   : > { %v242_v33 = vrot.slane %v241_v32, 1 }
 0x1c3   : > { %v243_v34 = vadd.f32 %v242_v33, %v241_v32 }
 0x1c5   : > { %371 = vpush %v243_v34 }
 0x1f6   : > { %s372_s17 = spop %371 }
 0x1f7   : > { %v245_v35 = vstv %s372_s17 }
 0x1f8   : > { %246 = vst [vmem:[%s199_s8] sm:$0xff] %v245_v35 }
 0x1f9   : > { %519 = shalt.err (!%p516_p0)
}
 0x1fa   : > { %377 = dma.vmem_to_hbm [thread:$0]  (%p629_p11), %s261_s14, 128, %s263_s16, %s248_s29  }
 0x1fb PF: > { %s274_s23 = sand.u32 1, %s550_s9   ;;  %p758_p1 = scmp.ge.s32.totalorder %s562_s12, 2 }
 0x1fc   : > { %s275_s28 = scalar_lea.sflag [#allocation4], %s274_s23 }
 0x1fd   : > { %p387_p4 = pnand %p758_p1, %p633_p12 }
 0x1ff   : > { %p388_p7 = pneg %p387_p4 }
 0x201   : > { %545 = dma.done.wait (%p388_p7), %s275_s28, 128  }
 0x202   : > { %547 = vsyncadd (%p388_p7), %s275_s28, 4294967168  ;;  %p18_p5 = scmp.ge.s32.totalorder %s604_s15, 4   ;;  %s759_s9 = smov %s554_s10 }
 0x203   : > { %s760_s10 = smov %s558_s11  ;;  %s761_s11 = smov %s616_s18 }
 0x204   : > { %s762_s12 = smov %s604_s15  ;;  %20 = sbr.rel (!%p18_p5) target bundleno = 7 (0x7), region = 86 }
 0x209   :  { %281 = vsyncpa [#allocation3], 1 }
 0x20a   :  { %283 = vsyncpa [#allocation3 + $0x1], 1 }
 0x20b   :  { %284 = vsyncpa [#allocation6], 1 }
 0x20c   :  { %286 = vsyncpa [#allocation6 + $0x1], 1 }
 0x20d   :  { %287 = vsyncpa [#allocation4], 1 }
 0x20e   :  { %289 = vsyncpa [#allocation4 + $0x1], 1 }

</bundles_post_ra>
